<compile_context>
chip_gen: v5e
topology: v5e:2x2
jax: 0.10.0
libtpu: 0.0.40
codegen_flags: <defaults>
</compile_context>

<pallas_src>
import functools

import jax
import jax.numpy as jnp
from jax.experimental import pallas as pl
from jax.experimental.pallas import tpu as pltpu


def _round_up(n, m):
    return ((n + m - 1) // m) * m


def make_decoder_kernel(num_layers, use_dropout):
    """Kernel refs: (x, w0, b0, ..., w_{L-1}, b_{L-1}, [m0 .. m_{L-2}], out)."""

    def kernel(*refs):
        x_ref = refs[0]
        out_ref = refs[-1]
        rest = refs[1:-1]
        wb = rest[: 2 * num_layers]          # resident weights/biases
        masks = rest[2 * num_layers:]        # per-hidden-layer dropout masks (tiled)

        h = x_ref[...]                       # f32 (TILE_B, d_in)
        for i in range(num_layers):
            w = wb[2 * i][...]               # bf16 (d_in, d_out)
            b = wb[2 * i + 1][...]           # f32  (1, d_out)
            # bf16 MXU inputs, f32 accumulate; elementwise math stays in f32.
            h = jnp.dot(h.astype(jnp.bfloat16), w,
                        preferred_element_type=jnp.float32) + b
            if i < num_layers - 1:
                h = jax.nn.sigmoid(h)        # EUP transcendental
                if use_dropout:
                    # mask already carries the 1/(1-p) rescale -> one VPU multiply.
                    h = h * masks[i][...]
        out_ref[...] = h.astype(out_ref.dtype)

    return kernel


def init_decoder_params(key, layer_dims):
    """Deterministic PyTorch-style Linear init: U(-1/sqrt(fan_in), 1/sqrt(fan_in))."""
    params = []
    for i in range(len(layer_dims) - 1):
        d_in, d_out = layer_dims[i], layer_dims[i + 1]
        key, kw, kb = jax.random.split(key, 3)
        bound = 1.0 / jnp.sqrt(jnp.float32(d_in))
        w = jax.random.uniform(kw, (d_out, d_in), jnp.float32, -bound, bound)  # PyTorch (out, in)
        b = jax.random.uniform(kb, (d_out,), jnp.float32, -bound, bound)
        params.append((w, b))
    return params


@functools.partial(jax.jit, static_argnames=("use_dropout", "dropout_p"))
def decoder_forward(x, params, key, *, use_dropout, dropout_p):
    # x: (B, embedding_dim, 1) -> squeeze -> (B, embedding_dim)
    x2d = jnp.squeeze(x, axis=-1).astype(jnp.float32)
    B, d_in = x2d.shape
    num_layers = len(params)
    out_dim = params[-1][0].shape[0]          # last weight is PyTorch (out, in)

    # Sublane-friendly batch tile (multiple of 8), capped so VMEM stays tiny even on v7x.
    TILE_B = min(512, _round_up(B, 8))
    B_pad = _round_up(B, TILE_B)
    x_pad = jnp.pad(x2d, ((0, B_pad - B), (0, 0)))

    flat_inputs = []
    in_specs = [pl.BlockSpec((TILE_B, d_in), lambda i: (i, 0))]   # x: tiled over batch

    # Weights/biases: resident across the whole grid (a few KB total).
    for (w, b) in params:
        wT = jnp.asarray(w).T.astype(jnp.bfloat16)                # (in, out) bf16 for MXU
        b2 = jnp.asarray(b).reshape(1, -1).astype(jnp.float32)    # (1, out)  f32
        flat_inputs += [wT, b2]
        in_specs += [pl.BlockSpec(wT.shape, lambda i: (0, 0)),
                     pl.BlockSpec(b2.shape, lambda i: (0, 0))]

    # Dropout keep-masks (torch.dropout(train=True, p)): generated wrapper-side because
    # pltpu.prng_* has no CPU-interpret lowering; scale folded in so kernel does 1 multiply.
    if use_dropout:
        scale = jnp.float32(1.0 / (1.0 - dropout_p))
        for i in range(num_layers - 1):
            d_out = params[i][0].shape[0]
            key, k = jax.random.split(key)
            keep = jax.random.bernoulli(k, 1.0 - dropout_p, (B_pad, d_out))
            mask = jnp.where(keep, scale, jnp.float32(0.0))
            flat_inputs.append(mask)
            in_specs.append(pl.BlockSpec((TILE_B, d_out), lambda i: (i, 0)))

    kernel = make_decoder_kernel(num_layers, use_dropout)

    out = pl.pallas_call(
        kernel,
        out_shape=jax.ShapeDtypeStruct((B_pad, out_dim), jnp.float32),
        grid=(pl.cdiv(B_pad, TILE_B),),
        in_specs=in_specs,
        out_specs=pl.BlockSpec((TILE_B, out_dim), lambda i: (i, 0)),
        compiler_params=pltpu.CompilerParams(
            dimension_semantics=("parallel",),   # megacore sharding on v7x
        ),
    )(x_pad, *flat_inputs)

    # Drop batch padding, unsqueeze(-1) like the PyTorch module.
    return out[:B, :, None]


if __name__ == "__main__":
    # Synthetic config mirroring the PyTorch module's __init__.
    config = {
        "model": {
            "embedding_dim": 32,
            "hidden_dim": [64, 48],   # reversed inside the decoder -> [48, 64]
            "dropout": 0.1,
            "mode": "epistemic",      # -> use_dropout = True (exercises dropout path)
        },
        "data": {"seq_len": 8},
    }

    input_dim = config["model"]["embedding_dim"]
    hidden_dims = config["model"]["hidden_dim"][::-1]
    output_dim = config["data"]["seq_len"]
    use_dropout = config["model"]["mode"] in ["epistemic", "combined"]
    dropout_p = config["model"]["dropout"]
    layer_dims = [input_dim] + hidden_dims + [output_dim]   # [32, 48, 64, 8]

    key = jax.random.PRNGKey(0)
    key, k_x, k_p, k_d = jax.random.split(key, 4)

    B = 2
    x = jax.random.normal(k_x, (B, input_dim, 1), jnp.float32)
    params = init_decoder_params(k_p, layer_dims)

    y = decoder_forward(x, params, k_d, use_dropout=use_dropout, dropout_p=dropout_p)
    y = jax.block_until_ready(y)
    assert y.shape == (B, output_dim, 1), y.shape
    assert bool(jnp.all(jnp.isfinite(y)))
    print("KERNEL_OK")
</pallas_src>

<mosaic_0001>
module attributes {stable_mosaic.version = 11 : i64} {
  func.func @kernel(%arg0: i32, %arg1: memref<8x32xf32, #tpu.memory_space<vmem>>, %arg2: memref<32x48xbf16, #tpu.memory_space<vmem>>, %arg3: memref<1x48xf32, #tpu.memory_space<vmem>>, %arg4: memref<48x64xbf16, #tpu.memory_space<vmem>>, %arg5: memref<1x64xf32, #tpu.memory_space<vmem>>, %arg6: memref<64x8xbf16, #tpu.memory_space<vmem>>, %arg7: memref<1x8xf32, #tpu.memory_space<vmem>>, %arg8: memref<8x48xf32, #tpu.memory_space<vmem>>, %arg9: memref<8x64xf32, #tpu.memory_space<vmem>>, %arg10: memref<8x8xf32, #tpu.memory_space<vmem>>) attributes {dimension_semantics = [#tpu.dimension_semantics<parallel>], iteration_bounds = array<i64: 1>, scalar_prefetch = 0 : i64, scratch_operands = 0 : i64, tpu.core_type = #tpu.core_type<tc>, window_params = [{transform_indices = @transform_0, window_bounds = array<i64: 8, 32>}, {pipeline_mode = #tpu.pipeline_mode<synchronous>, transform_indices = @transform_1, window_bounds = array<i64: 32, 48>}, {pipeline_mode = #tpu.pipeline_mode<synchronous>, transform_indices = @transform_2, window_bounds = array<i64: 1, 48>}, {pipeline_mode = #tpu.pipeline_mode<synchronous>, transform_indices = @transform_3, window_bounds = array<i64: 48, 64>}, {pipeline_mode = #tpu.pipeline_mode<synchronous>, transform_indices = @transform_4, window_bounds = array<i64: 1, 64>}, {pipeline_mode = #tpu.pipeline_mode<synchronous>, transform_indices = @transform_5, window_bounds = array<i64: 64, 8>}, {pipeline_mode = #tpu.pipeline_mode<synchronous>, transform_indices = @transform_6, window_bounds = array<i64: 1, 8>}, {transform_indices = @transform_7, window_bounds = array<i64: 8, 48>}, {transform_indices = @transform_8, window_bounds = array<i64: 8, 64>}, {transform_indices = @transform_9, window_bounds = array<i64: 8, 8>}]} {
    %c0 = arith.constant 0 : index
    %c0_0 = arith.constant 0 : index
    %0 = vector.load %arg1[%c0, %c0_0] : memref<8x32xf32, #tpu.memory_space<vmem>>, vector<8x32xf32>
    %c0_1 = arith.constant 0 : index
    %c0_2 = arith.constant 0 : index
    %1 = vector.load %arg2[%c0_1, %c0_2] : memref<32x48xbf16, #tpu.memory_space<vmem>>, vector<32x48xbf16>
    %c0_3 = arith.constant 0 : index
    %c0_4 = arith.constant 0 : index
    %2 = vector.load %arg3[%c0_3, %c0_4] : memref<1x48xf32, #tpu.memory_space<vmem>>, vector<1x48xf32>
    %3 = arith.truncf %0 : vector<8x32xf32> to vector<8x32xbf16>
    %cst = arith.constant dense<0.000000e+00> : vector<8x48xf32>
    %4 = tpu.matmul %3, %1, %cst {dimension_numbers = #tpu.dot_dimension_numbers<[1], [0], [0], [1], [0, 0, 1, 1], [], []>} : vector<8x32xbf16>, vector<32x48xbf16>, vector<8x48xf32> -> vector<8x48xf32>
    %5 = vector.broadcast %2 : vector<1x48xf32> to vector<8x48xf32>
    %6 = arith.addf %4, %5 : vector<8x48xf32>
    %7 = arith.negf %6 : vector<8x48xf32>
    %8 = math.exp %7 : vector<8x48xf32>
    %cst_5 = arith.constant 1.000000e+00 : f32
    %9 = vector.broadcast %cst_5 : f32 to vector<8x48xf32>
    %10 = arith.addf %9, %8 : vector<8x48xf32>
    %11 = arith.divf %9, %10 : vector<8x48xf32>
    %c0_6 = arith.constant 0 : index
    %c0_7 = arith.constant 0 : index
    %12 = vector.load %arg8[%c0_6, %c0_7] : memref<8x48xf32, #tpu.memory_space<vmem>>, vector<8x48xf32>
    %13 = arith.mulf %11, %12 : vector<8x48xf32>
    %c0_8 = arith.constant 0 : index
    %c0_9 = arith.constant 0 : index
    %14 = vector.load %arg4[%c0_8, %c0_9] : memref<48x64xbf16, #tpu.memory_space<vmem>>, vector<48x64xbf16>
    %c0_10 = arith.constant 0 : index
    %c0_11 = arith.constant 0 : index
    %15 = vector.load %arg5[%c0_10, %c0_11] : memref<1x64xf32, #tpu.memory_space<vmem>>, vector<1x64xf32>
    %16 = arith.truncf %13 : vector<8x48xf32> to vector<8x48xbf16>
    %cst_12 = arith.constant dense<0.000000e+00> : vector<8x64xf32>
    %17 = tpu.matmul %16, %14, %cst_12 {dimension_numbers = #tpu.dot_dimension_numbers<[1], [0], [0], [1], [0, 0, 1, 1], [], []>} : vector<8x48xbf16>, vector<48x64xbf16>, vector<8x64xf32> -> vector<8x64xf32>
    %18 = vector.broadcast %15 : vector<1x64xf32> to vector<8x64xf32>
    %19 = arith.addf %17, %18 : vector<8x64xf32>
    %20 = arith.negf %19 : vector<8x64xf32>
    %21 = math.exp %20 : vector<8x64xf32>
    %cst_13 = arith.constant 1.000000e+00 : f32
    %22 = vector.broadcast %cst_13 : f32 to vector<8x64xf32>
    %23 = arith.addf %22, %21 : vector<8x64xf32>
    %24 = arith.divf %22, %23 : vector<8x64xf32>
    %c0_14 = arith.constant 0 : index
    %c0_15 = arith.constant 0 : index
    %25 = vector.load %arg9[%c0_14, %c0_15] : memref<8x64xf32, #tpu.memory_space<vmem>>, vector<8x64xf32>
    %26 = arith.mulf %24, %25 : vector<8x64xf32>
    %c0_16 = arith.constant 0 : index
    %c0_17 = arith.constant 0 : index
    %27 = vector.load %arg6[%c0_16, %c0_17] : memref<64x8xbf16, #tpu.memory_space<vmem>>, vector<64x8xbf16>
    %c0_18 = arith.constant 0 : index
    %c0_19 = arith.constant 0 : index
    %28 = vector.load %arg7[%c0_18, %c0_19] : memref<1x8xf32, #tpu.memory_space<vmem>>, vector<1x8xf32>
    %29 = arith.truncf %26 : vector<8x64xf32> to vector<8x64xbf16>
    %cst_20 = arith.constant dense<0.000000e+00> : vector<8x8xf32>
    %30 = tpu.matmul %29, %27, %cst_20 {dimension_numbers = #tpu.dot_dimension_numbers<[1], [0], [0], [1], [0, 0, 1, 1], [], []>} : vector<8x64xbf16>, vector<64x8xbf16>, vector<8x8xf32> -> vector<8x8xf32>
    %31 = vector.broadcast %28 : vector<1x8xf32> to vector<8x8xf32>
    %32 = arith.addf %30, %31 : vector<8x8xf32>
    %c0_21 = arith.constant 0 : index
    %c0_22 = arith.constant 0 : index
    %33 = vector.load %arg10[%c0_21, %c0_22] : memref<8x8xf32, #tpu.memory_space<vmem>>, vector<8x8xf32>
    tpu.vector_store %arg10[%c0_21, %c0_22], %32 {strides = array<i32>} : memref<8x8xf32, #tpu.memory_space<vmem>>, vector<8x8xf32>,
    return
  }
  func.func @transform_0(%arg0: i32) -> (i32, i32) {
    %c0_i32 = arith.constant 0 : i32
    %c0_i32_0 = arith.constant 0 : i32
    return %arg0, %c0_i32 : i32, i32
  }
  func.func @transform_1(%arg0: i32) -> (i32, i32) {
    %c0_i32 = arith.constant 0 : i32
    %c0_i32_0 = arith.constant 0 : i32
    %c0_i32_1 = arith.constant 0 : i32
    return %c0_i32, %c0_i32_0 : i32, i32
  }
  func.func @transform_2(%arg0: i32) -> (i32, i32) {
    %c0_i32 = arith.constant 0 : i32
    %c0_i32_0 = arith.constant 0 : i32
    %c0_i32_1 = arith.constant 0 : i32
    return %c0_i32, %c0_i32_0 : i32, i32
  }
  func.func @transform_3(%arg0: i32) -> (i32, i32) {
    %c0_i32 = arith.constant 0 : i32
    %c0_i32_0 = arith.constant 0 : i32
    %c0_i32_1 = arith.constant 0 : i32
    return %c0_i32, %c0_i32_0 : i32, i32
  }
  func.func @transform_4(%arg0: i32) -> (i32, i32) {
    %c0_i32 = arith.constant 0 : i32
    %c0_i32_0 = arith.constant 0 : i32
    %c0_i32_1 = arith.constant 0 : i32
    return %c0_i32, %c0_i32_0 : i32, i32
  }
  func.func @transform_5(%arg0: i32) -> (i32, i32) {
    %c0_i32 = arith.constant 0 : i32
    %c0_i32_0 = arith.constant 0 : i32
    %c0_i32_1 = arith.constant 0 : i32
    return %c0_i32, %c0_i32_0 : i32, i32
  }
  func.func @transform_6(%arg0: i32) -> (i32, i32) {
    %c0_i32 = arith.constant 0 : i32
    %c0_i32_0 = arith.constant 0 : i32
    %c0_i32_1 = arith.constant 0 : i32
    return %c0_i32, %c0_i32_0 : i32, i32
  }
  func.func @transform_7(%arg0: i32) -> (i32, i32) {
    %c0_i32 = arith.constant 0 : i32
    %c0_i32_0 = arith.constant 0 : i32
    return %arg0, %c0_i32 : i32, i32
  }
  func.func @transform_8(%arg0: i32) -> (i32, i32) {
    %c0_i32 = arith.constant 0 : i32
    %c0_i32_0 = arith.constant 0 : i32
    return %arg0, %c0_i32 : i32, i32
  }
  func.func @transform_9(%arg0: i32) -> (i32, i32) {
    %c0_i32 = arith.constant 0 : i32
    %c0_i32_0 = arith.constant 0 : i32
    return %arg0, %c0_i32 : i32, i32
  }
}

</mosaic_0001>

<bundles_post_ra>
// kernel: decoder_forward.1
= control target key start
LH: loop header
LB: loop body
LE: loop exit
PB: predicated region body
PF: predicated region fallthrough
CT: control target
= control target key end

     0   :  { %vm55_vm0 = vcmask 261120   ;;  %vm122_vm5 = vcmask 392192   ;;  %vm197_vm10 = vcmask 523264   ;;  %vm214_vm11 = vcmask 64512   ;;  %s379_s1 = inlined_call_operand.vmem [shape: bf16[32,48], index: 1, kind: input, shape index: {}]   ;;  %s380_s0 = inlined_call_operand.vmem [shape: f32[8,32], index: 0, kind: input, shape index: {}]   ;;  %s381_s2 = inlined_call_operand.vmem [shape: f32[1,48], index: 2, kind: input, shape index: {}]   ;;  %s382_s4 = inlined_call_operand.vmem [shape: f32[1,64], index: 4, kind: input, shape index: {}]   ;;  %s383_s3 = inlined_call_operand.vmem [shape: bf16[48,64], index: 3, kind: input, shape index: {}]   ;;  %s384_s7 = inlined_call_operand.vmem [shape: f32[8,48], index: 7, kind: input, shape index: {}]   ;;  %s385_s6 = inlined_call_operand.vmem [shape: f32[1,8], index: 6, kind: input, shape index: {}]   ;;  %s386_s5 = inlined_call_operand.vmem [shape: bf16[64,8], index: 5, kind: input, shape index: {}]   ;;  %s387_s8 = inlined_call_operand.vmem [shape: f32[8,64], index: 8, kind: input, shape index: {}]   ;;  %s388_s9 = inlined_call_operand.vmem [shape: f32[8,8], index: 9, kind: output, shape index: {}]  }
   0x1   :  { %v262_v0 = vld [vmem:[%s379_s1 + $0x8] sm:$0xff]  ;;  %v261_v1 = vld [vmem:[%s379_s1] sm:$0xff]  ;;  %v265_v4 = vld [vmem:[%s383_s3 + $0x10] sm:$0xff] }
   0x2   :  { %65 = vmatpush.bf16.msra.mxu0 %v262_v0  ;;  %v33_v2 = vld [vmem:[%s380_s0] sm:$0xff]  ;;  %131 = vmatpush.bf16.msra.mxu1 %v265_v4  ;;  %v264_v5 = vld [vmem:[%s383_s3 + $0x8] sm:$0xff]  ;;  %v269_v27 = vld [vmem:[%s386_s5 + $0x18] sm:$0xff] }
   0x3   :  { %v39_v3 = vpack.c.bf16 %v33_v2, %v33_v2  ;;  %v263_v6 = vld [vmem:[%s383_s3] sm:$0xff]  ;;  %205 = vmatpush.bf16.msra.mxu2 %v269_v27  ;;  %v268_v28 = vld [vmem:[%s386_s5 + $0x10] sm:$0xff]  ;;  %v267_v29 = vld [vmem:[%s386_s5 + $0x8] sm:$0xff] }
   0x4   :  { %v270_v7 = vld [vmem:[%s381_s2] ss:$0 sm:$0xff] }
   0x5   :  { %v91_v22 = vld [vmem:[%s384_s7] sm:$0xff] }
   0x6   :  { %66 = vmatpush.bf16.msra.mxu0 %v261_v1  ;;  %132 = vmatpush.bf16.msra.mxu1 %v264_v5  ;;  %v266_v30 = vld [vmem:[%s386_s5] sm:$0xff] }
   0x7   :  { %206 = vmatpush.bf16.msra.mxu2 %v268_v28  ;;  %v271_v31 = vld [vmem:[%s382_s4] ss:$0 sm:$0xff] }
   0x8   :  { %v158_v46 = vld [vmem:[%s387_s8] sm:$0xff] }
   0x9   :  { %228 = vmatmul.msk.bf16.vlgmr.msra.gmra.mxu0 %vm55_vm0, %v39_v3  ;;  %v272_v51 = vld [vmem:[%s385_s6] ss:$0 sm:$0xff] }
   0xa   :  { %133 = vmatpush.bf16.msra.mxu1 %v263_v6 }
   0xb   :  { %207 = vmatpush.bf16.msra.mxu2 %v267_v29 }
   0xf   :  { %208 = vmatpush.bf16.msra.mxu2 %v266_v30 }
  0x86   :  { %v68_v8 = vpop.f32.mrf.mxu0 }
  0x87   :  { %v69_v9 = vadd.f32 %v270_v7, %v68_v8 }
  0x89   :  { %v229_v10 = vmul.f32 -1.442695, %v69_v9 }
  0x8b   :  { %273 = vpow2.f32 %v229_v10 }
  0x8e   :  { %v70_v11 = vpop.f32.mrf.mxu0 }
  0x91   :  { %v274_v12 = vpop.eup %273 }
  0x92   :  { %v75_v13 = vadd.f32 1.0, %v274_v12 }
  0x94   :  { %275 = vrcp.f32 %v75_v13  ;;  %v87_v17 = vand.u32 2147483648, %v75_v13  ;;  %v85_v19 = vand.u32 2147483647, %v75_v13  ;;  %vm81_vm2 = vweird.f32 %v75_v13 }
  0x96   :  { %v88_v21 = vor.u32 1.1754944e-38, %v87_v17  ;;  %vm86_vm4 = vcmp.eq.f32.partialorder %v85_v19, 8.507059e+37 }
  0x9a   :  { %v276_v14 = vpop.eup %275 }
  0x9b   :  { %v77_v15 = vmul.f32 %v276_v14, %v75_v13  ;;  %vm82_vm1 = vweird.f32 %v276_v14 }
  0x9c   :  { %vm83_vm3 = vmor %vm81_vm2, %vm82_vm1 }
  0x9d   :  { %v78_v16 = vsub.f32 1.0, %v77_v15 }
  0x9f   :  { %v79_v18 = vmul.f32 %v276_v14, %v78_v16 }
  0xa1   :  { %v80_v20 = vadd.f32 %v276_v14, %v79_v18 }
  0xa3   :  { %v84_v23 = vsel %vm83_vm3, %v276_v14, %v80_v20 }
  0xa4   :  { %v89_v24 = vsel %vm86_vm4, %v88_v21, %v84_v23 }
  0xa5   :  { %v92_v25 = vmul.f32 %v91_v22, %v89_v24 }
  0xa7   :  { %v100_v26 = vpack.c.bf16 %v92_v25, %v92_v25 }
  0xa9   :  { %242 = vmatmul.msk.bf16.vlgmr.msra.gmra.mxu1 %vm122_vm5, %v100_v26 }
 0x126   :  { %v135_v32 = vpop.f32.mrf.mxu1 }
 0x127   :  { %v136_v33 = vadd.f32 %v271_v31, %v135_v32 }
 0x129   :  { %v243_v34 = vmul.f32 -1.442695, %v136_v33 }
 0x12b   :  { %277 = vpow2.f32 %v243_v34 }
 0x12e   :  { %v137_v35 = vpop.f32.mrf.mxu1 }
 0x131   :  { %v278_v36 = vpop.eup %277 }
 0x132   :  { %v142_v37 = vadd.f32 1.0, %v278_v36 }
 0x134   :  { %279 = vrcp.f32 %v142_v37  ;;  %v154_v41 = vand.u32 2147483648, %v142_v37  ;;  %v152_v43 = vand.u32 2147483647, %v142_v37  ;;  %vm148_vm7 = vweird.f32 %v142_v37 }
 0x136   :  { %v155_v45 = vor.u32 1.1754944e-38, %v154_v41  ;;  %vm153_vm9 = vcmp.eq.f32.partialorder %v152_v43, 8.507059e+37 }
 0x13a   :  { %v280_v38 = vpop.eup %279 }
 0x13b   :  { %v144_v39 = vmul.f32 %v280_v38, %v142_v37  ;;  %vm149_vm6 = vweird.f32 %v280_v38 }
 0x13c   :  { %vm150_vm8 = vmor %vm148_vm7, %vm149_vm6 }
 0x13d   :  { %v145_v40 = vsub.f32 1.0, %v144_v39 }
 0x13f   :  { %v146_v42 = vmul.f32 %v280_v38, %v145_v40 }
 0x141   :  { %v147_v44 = vadd.f32 %v280_v38, %v146_v42 }
 0x143   :  { %v151_v47 = vsel %vm150_vm8, %v280_v38, %v147_v44 }
 0x144   :  { %v156_v48 = vsel %vm153_vm9, %v155_v45, %v151_v47 }
 0x145   :  { %v159_v49 = vmul.f32 %v158_v46, %v156_v48 }
 0x147   :  { %v169_v50 = vpack.c.bf16 %v159_v49, %v159_v49 }
 0x149   :  { %260 = vmatmul.msk.bf16.vlgmr.msra.gmra.mxu2 %vm197_vm10, %v169_v50 }
 0x1cc   :  { %v210_v52 = vpop.f32.mrf.mxu2 }
 0x1cd   :  { %v211_v53 = vadd.f32 %v272_v51, %v210_v52 }
 0x1cf   :  { %215 = vst.msk [vmem:[%s388_s9] sm:$0xff] %vm214_vm11, %v211_v53 }
 0x1d4   :  { %v212_v54 = vpop.f32.mrf.mxu2 }

</bundles_post_ra>
